<compile_context>
chip_gen: v5e
topology: v5e:2x2
jax: 0.10.0
libtpu: 0.0.40
codegen_flags: <defaults>
</compile_context>

<pallas_src>
import jax
import jax.numpy as jnp
from jax.experimental import pallas as pl
from jax.experimental.pallas import tpu as pltpu


def _add_kernel(w_ref, x_ref, o_ref):
    # Elementwise add of the current tile on the VPU.
    o_ref[...] = w_ref[...] + x_ref[...]


_TARGET_TILE_BYTES = 2 * 1024 * 1024   # ~2 MiB per operand per grid step
_MAX_LANES = 32768                     # widest lane-dense last dim we use


def _pick_lane_width(total_elems, itemsize):
    """Largest multiple of 128 that divides total_elems while keeping an
    8-sublane tile within the target tile size. None if no such divisor."""
    cap = min(_MAX_LANES, max(128, _TARGET_TILE_BYTES // (8 * itemsize)))
    best = None
    for c in range(128, cap + 1, 128):
        if total_elems % c == 0:
            best = c
    return best


def _pick_tile_rows(total_rows, lane_width, itemsize):
    """Tile row count: multiple of 8 (or the full row extent), sized so one
    tile is ~_TARGET_TILE_BYTES per operand."""
    rows = _TARGET_TILE_BYTES // (lane_width * itemsize)
    rows = max(8, (rows // 8) * 8)
    if rows >= total_rows:
        return total_rows   # single block along rows; full dim is always legal
    return rows             # multiple of 8 -> satisfies the (8, 128) rule


def mymodule_forward(weight: jax.Array, x: jax.Array) -> jax.Array:
    """output = weight + x, computed by a tiled, lane-dense Pallas TPU kernel."""
    if x.shape != weight.shape:
        # Match torch broadcasting of `self.weight + input`.
        x = jnp.broadcast_to(x, weight.shape)
    assert x.dtype == weight.dtype, "weight/input dtype mismatch"

    N, M = weight.shape
    itemsize = jnp.dtype(weight.dtype).itemsize
    total = N * M

    lane_width = _pick_lane_width(total, itemsize)
    if lane_width is not None:
        # Lane-dense flattened view (free for contiguous row-major data).
        rows = total // lane_width
        w2 = weight.reshape(rows, lane_width)
        x2 = x.reshape(rows, lane_width)
    else:
        # total not a multiple of 128: tile the original (N, M) layout
        # (lane dim = M = full array dim, which is always legal).
        rows, lane_width = N, M
        w2, x2 = weight, x

    tile_rows = _pick_tile_rows(rows, lane_width, itemsize)
    grid = (pl.cdiv(rows, tile_rows),)

    spec = pl.BlockSpec((tile_rows, lane_width), lambda i: (i, 0))
    out = pl.pallas_call(
        _add_kernel,
        out_shape=jax.ShapeDtypeStruct((rows, lane_width), weight.dtype),
        grid_spec=pltpu.PrefetchScalarGridSpec(
            num_scalar_prefetch=0,
            grid=grid,
            in_specs=[spec, spec],
            out_specs=spec,
        ),
        compiler_params=pltpu.CompilerParams(
            dimension_semantics=("parallel",),
        ),
    )(w2, x2)

    return out.reshape(N, M)


if __name__ == "__main__":
    # Module shapes: weight is (N, M). Small, (8, 128)-friendly test sizes.
    N, M = 32, 128

    key = jax.random.PRNGKey(0)
    k_w, k_x = jax.random.split(key)

    # torch.rand(N, M) -> uniform [0, 1), float32. Deterministic synthetic init.
    weight = jax.random.uniform(k_w, (N, M), dtype=jnp.float32)
    x = jax.random.uniform(k_x, (N, M), dtype=jnp.float32)

    out = jax.block_until_ready(mymodule_forward(weight, x))

    # Correctness check against the trivial JAX reference.
    expected = weight + x
    assert out.shape == (N, M) and out.dtype == jnp.float32
    assert jnp.allclose(out, expected, atol=1e-6, rtol=1e-6)

    # Also exercise a larger, multi-grid-step path (ragged row count on purpose).
    N2, M2 = 4104, 128   # 4104 rows -> lane-dense reshape + cdiv grid, ragged tail
    w2 = jax.random.uniform(k_w, (N2, M2), dtype=jnp.float32)
    x2 = jax.random.uniform(k_x, (N2, M2), dtype=jnp.float32)
    out2 = jax.block_until_ready(mymodule_forward(w2, x2))
    assert jnp.allclose(out2, w2 + x2, atol=1e-6, rtol=1e-6)

    print("KERNEL_OK")
</pallas_src>

<mosaic_0001>
module attributes {stable_mosaic.version = 11 : i64} {
  func.func @_add_kernel(%arg0: i32, %arg1: memref<1x4096xf32, #tpu.memory_space<vmem>>, %arg2: memref<1x4096xf32, #tpu.memory_space<vmem>>, %arg3: memref<1x4096xf32, #tpu.memory_space<vmem>>) attributes {dimension_semantics = [#tpu.dimension_semantics<parallel>], iteration_bounds = array<i64: 1>, scalar_prefetch = 0 : i64, scratch_operands = 0 : i64, tpu.core_type = #tpu.core_type<tc>, window_params = [{transform_indices = @transform_0, window_bounds = array<i64: 1, 4096>}, {transform_indices = @transform_1, window_bounds = array<i64: 1, 4096>}, {transform_indices = @transform_2, window_bounds = array<i64: 1, 4096>}]} {
    %c0 = arith.constant 0 : index
    %c0_0 = arith.constant 0 : index
    %0 = vector.load %arg1[%c0, %c0_0] : memref<1x4096xf32, #tpu.memory_space<vmem>>, vector<1x4096xf32>
    %c0_1 = arith.constant 0 : index
    %c0_2 = arith.constant 0 : index
    %1 = vector.load %arg2[%c0_1, %c0_2] : memref<1x4096xf32, #tpu.memory_space<vmem>>, vector<1x4096xf32>
    %2 = arith.addf %0, %1 : vector<1x4096xf32>
    %c0_3 = arith.constant 0 : index
    %c0_4 = arith.constant 0 : index
    %3 = vector.load %arg3[%c0_3, %c0_4] : memref<1x4096xf32, #tpu.memory_space<vmem>>, vector<1x4096xf32>
    tpu.vector_store %arg3[%c0_3, %c0_4], %2 {strides = array<i32>} : memref<1x4096xf32, #tpu.memory_space<vmem>>, vector<1x4096xf32>,
    return
  }
  func.func @transform_0(%arg0: i32) -> (i32, i32) {
    %c0_i32 = arith.constant 0 : i32
    %c0_i32_0 = arith.constant 0 : i32
    return %arg0, %c0_i32 : i32, i32
  }
  func.func @transform_1(%arg0: i32) -> (i32, i32) {
    %c0_i32 = arith.constant 0 : i32
    %c0_i32_0 = arith.constant 0 : i32
    return %arg0, %c0_i32 : i32, i32
  }
  func.func @transform_2(%arg0: i32) -> (i32, i32) {
    %c0_i32 = arith.constant 0 : i32
    %c0_i32_0 = arith.constant 0 : i32
    return %arg0, %c0_i32 : i32, i32
  }
}

</mosaic_0001>

<bundles_post_ra>
// kernel: tpu_custom_call.1
= control target key start
LH: loop header
LB: loop body
LE: loop exit
PB: predicated region body
PF: predicated region fallthrough
CT: control target
= control target key end

     0   :  { %7 = vsyncpa [#allocation3], 0  ;;  %s182_s0 = inlined_call_operand.hbm [shape: f32[1,4096], index: 0, kind: input, shape index: {}]   ;;  %s183_s1 = inlined_call_operand.hbm [shape: f32[1,4096], index: 1, kind: input, shape index: {}]   ;;  %s184_s2 = inlined_call_operand.hbm [shape: f32[1,4096], index: 2, kind: output, shape index: {}]  }
   0x1   :  { %8 = vsyncpa [#allocation6], 0 }
   0x2   :  { %9 = vsyncpa [#allocation4], 0  ;;  %s15_s11 = sshll.u32 %s182_s0, 4  ;;  %s155_s12 = smov [#allocation2]   ;;  %s16_s11 = int_to_ptr.hbm [resolvable:$true] %s15_s11 }
   0x3   :  { %s17_s13 = sshll.u32 %s155_s12, 4  ;;  %s26_s16 = sshll.u32 %s183_s1, 4  ;;  %s18_s13 = int_to_ptr.vmem [resolvable:$true] %s17_s13  ;;  %s27_s16 = int_to_ptr.hbm [resolvable:$true] %s26_s16 }
   0x4   :  { %20 = dma.hbm_to_vmem [thread:$0]  %s16_s11, 512, %s18_s13, [#allocation3]  }
   0x5   :  { %s156_s17 = smov [#allocation5]  }
   0x6   :  { %s28_s18 = sshll.u32 %s156_s17, 4  ;;  %s29_s18 = int_to_ptr.vmem [resolvable:$true] %s28_s18 }
   0x7   :  { %31 = dma.hbm_to_vmem [thread:$0]  %s27_s16, 512, %s29_s18, [#allocation6]  }
   0x8   :  { %149 = dma.done.wait [#allocation3], 512  }
   0x9   :  { %150 = vsyncadd [#allocation3], 4294966784 }
   0xa   :  { %151 = dma.done.wait [#allocation6], 512  }
   0xb   :  { %152 = vsyncadd [#allocation6], 4294966784  ;;  %v40_v0 = vld [vmem:[#allocation2] sm:$0xff]  ;;  %v41_v2 = vld [vmem:[#allocation2 + $0x8] sm:$0xff]  ;;  %s157_s0 = smov [#allocation7]   ;;  %s63_s21 = sshll.u32 %s184_s2, 4  ;;  %s64_s21 = int_to_ptr.hbm [resolvable:$true] %s63_s21 }
   0xc   :  { %v44_v1 = vld [vmem:[#allocation5] sm:$0xff]  ;;  %v45_v4 = vld [vmem:[#allocation5 + $0x8] sm:$0xff]  ;;  %v42_v5 = vld [vmem:[#allocation2 + $0x10] sm:$0xff]  ;;  %s61_s19 = sshll.u32 %s157_s0, 4  ;;  %s62_s19 = int_to_ptr.vmem [resolvable:$true] %s61_s19 }
   0xd   :  { %v48_v3 = vadd.f32 %v44_v1, %v40_v0  ;;  %v46_v6 = vld [vmem:[#allocation5 + $0x10] sm:$0xff]  ;;  %v49_v7 = vadd.f32 %v45_v4, %v41_v2  ;;  %v43_v9 = vld [vmem:[#allocation2 + $0x18] sm:$0xff] }
   0xe   :  { %v50_v8 = vadd.f32 %v46_v6, %v42_v5  ;;  %v47_v10 = vld [vmem:[#allocation5 + $0x18] sm:$0xff] }
   0xf   :  { %52 = vst [vmem:[#allocation7] sm:$0xff] %v48_v3  ;;  %v51_v11 = vadd.f32 %v47_v10, %v43_v9 }
  0x10   :  { %53 = vst [vmem:[#allocation7 + $0x8] sm:$0xff] %v49_v7 }
  0x11   :  { %54 = vst [vmem:[#allocation7 + $0x10] sm:$0xff] %v50_v8 }
  0x12   :  { %55 = vst [vmem:[#allocation7 + $0x18] sm:$0xff] %v51_v11 }
  0x13   :  { %66 = dma.vmem_to_hbm [thread:$0]  %s62_s19, 512, %s64_s21, [#allocation4]  }
  0x14   :  { %153 = dma.done.wait [#allocation4], 512  }
  0x15   :  { %154 = vsyncadd [#allocation4], 4294966784 }
  0x16   :  { %71 = vsyncpa [#allocation3], 1 }
  0x17   :  { %72 = vsyncpa [#allocation6], 1 }
  0x18   :  { %73 = vsyncpa [#allocation4], 1 }

</bundles_post_ra>
